<compile_context>
chip_gen: v6e
topology: v6e:2x2x1
jax: 0.10.0
libtpu: 0.0.40
codegen_flags: <defaults>
</compile_context>

<pallas_src>
import jax
import jax.numpy as jnp
from jax.experimental import pallas as pl
from jax.experimental.pallas import tpu as pltpu


def _round_up(x, m):
    return ((x + m - 1) // m) * m


# ----------------------------- kernel bodies ------------------------------ #

def _qkv_fused_kernel(x_ref, w_ref, b_ref, o_ref):
    # x: (TM, E)   w: (E, TN)   b: (1, TN)   o: (TM, TN)
    acc = jnp.dot(x_ref[...], w_ref[...], preferred_element_type=jnp.float32)
    o_ref[...] = (acc + b_ref[...]).astype(o_ref.dtype)


def _qkv_split_kernel(x_ref, w_ref, b_ref, q_ref, k_ref, v_ref):
    # Used only when E % 128 == 0: column splits land on lane boundaries, so
    # the three stores are unmasked and need no relayout.
    acc = jnp.dot(x_ref[...], w_ref[...], preferred_element_type=jnp.float32)
    acc = acc + b_ref[...]
    e = q_ref.shape[-1]
    q_ref[...] = acc[:, 0 * e:1 * e].astype(q_ref.dtype)
    k_ref[...] = acc[:, 1 * e:2 * e].astype(k_ref.dtype)
    v_ref[...] = acc[:, 2 * e:3 * e].astype(v_ref.dtype)


# --------------------------- sizing heuristics ----------------------------- #

def _vmem_budget_bytes():
    try:
        phys = int(pltpu.get_tpu_info().vmem_capacity_bytes)
    except Exception:
        phys = 64 << 20  # conservative fallback: v7x per-TensorCore VMEM
    # Leave headroom for Mosaic internal scratch; never request the whole chip.
    return min(phys * 3 // 4, 100 << 20)


def _vmem_estimate(tm, e, tn):
    # Double-buffered x tile + out tile(s) + weight tile + bias tile (f32),
    # plus ~1 MiB slack for Mosaic internal scratch.
    return 4 * (2 * tm * e + 2 * tm * tn + 2 * e * tn + 2 * tn) + (1 << 20)


def _choose_tm(m, e, tm, budget):
    # Keep the double-buffered (TM, E) f32 x-tile within ~1/3 of the budget.
    tm_cap = max(8, (((budget // 3) // (8 * e)) // 8) * 8)
    tm = max(8, min(tm, tm_cap))
    n = pl.cdiv(m, tm)
    if n == 1 and m > 8:
        n = 2  # >=2 M tiles so the "parallel" axis shards across v7x's 2 TCs
    tile_m = _round_up(pl.cdiv(m, n), 8)
    n = pl.cdiv(m, tile_m)
    return tile_m, n * tile_m


def _choose_tn(e, n3, tm, budget):
    np_full = _round_up(n3, 128)
    if _vmem_estimate(tm, e, np_full) <= budget:
        return np_full  # whole fused weight stays resident in VMEM
    for tn in (2048, 1024, 512, 256, 128):
        if tn < np_full and _vmem_estimate(tm, e, tn) <= budget:
            return tn
    # TODO(synk): add a K (contraction) grid axis + VMEM accumulator if even a
    # (TM, E) x (E, 128) tile pair does not fit VMEM (extremely large E).
    return 128


# -------------------------------- wrapper ---------------------------------- #

def diff_projection_attention(feats, wq, bq, wk, bk, wv, bv, *, tm=512):
    """feats: (B, S, E). Weights in PyTorch nn.Linear layout (out, in).

    Returns (Q, K, V), each (B, 1, S, E), equal to (feats @ W.T + b).unsqueeze(1)
    for the respective projection.
    """
    B, S, E = feats.shape
    M = B * S
    N3 = 3 * E

    budget = _vmem_budget_bytes()
    TM, Mp = _choose_tm(M, E, tm, budget)
    TN = _choose_tn(E, N3, TM, budget)
    use_split = (E % 128 == 0) and (TN == N3)       # lane-aligned 3-output path
    Np = N3 if use_split else _round_up(N3, TN)

    # ---- fuse + pre-transpose weights (once, in XLA, outside the kernel) ----
    # torch nn.Linear computes x @ W.T + b with W = (out, in); concatenate the
    # transposed weights along the output axis -> (E, 3E), pad cols to Np.
    w_fused = jnp.concatenate([wq.T, wk.T, wv.T], axis=1)
    w_fused = jnp.pad(w_fused, ((0, 0), (0, Np - N3)))
    b_fused = jnp.pad(jnp.concatenate([bq, bk, bv]), (0, Np - N3)).reshape(1, Np)

    # Token axis padded only (contraction axis untouched).
    x = jnp.pad(feats.reshape(M, E), ((0, Mp - M), (0, 0)))

    vmem_limit = int(min(max(_vmem_estimate(TM, E, TN) * 5 // 4, 16 << 20), budget))
    cost = pl.CostEstimate(
        flops=2 * Mp * E * Np,
        transcendentals=0,
        bytes_accessed=4 * (Mp * E + E * Np + Np + Mp * Np),
    )

    if use_split:
        grid = (Mp // TM,)
        q_p, k_p, v_p = pl.pallas_call(
            _qkv_split_kernel,
            out_shape=tuple(jax.ShapeDtypeStruct((Mp, E), feats.dtype)
                            for _ in range(3)),
            grid=grid,
            in_specs=[
                pl.BlockSpec((TM, E), lambda i: (i, 0)),   # x: pipelined over M
                pl.BlockSpec((E, Np), lambda i: (0, 0)),   # fused W: resident
                pl.BlockSpec((1, Np), lambda i: (0, 0)),   # fused bias: resident
            ],
            out_specs=tuple(pl.BlockSpec((TM, E), lambda i: (i, 0))
                            for _ in range(3)),
            compiler_params=pltpu.CompilerParams(
                dimension_semantics=("parallel",),
                vmem_limit_bytes=vmem_limit),
            cost_estimate=cost,
        )(x, w_fused, b_fused)
        q = q_p[:M].reshape(B, S, E)[:, None]
        k = k_p[:M].reshape(B, S, E)[:, None]
        v = v_p[:M].reshape(B, S, E)[:, None]
        return q, k, v

    grid = (Mp // TM, Np // TN)
    out = pl.pallas_call(
        _qkv_fused_kernel,
        out_shape=jax.ShapeDtypeStruct((Mp, Np), feats.dtype),
        grid=grid,
        in_specs=[
            pl.BlockSpec((TM, E), lambda i, j: (i, 0)),    # x tile (M pipelined)
            pl.BlockSpec((E, TN), lambda i, j: (0, j)),    # weight column tile
            pl.BlockSpec((1, TN), lambda i, j: (0, j)),    # bias column tile
        ],
        out_specs=pl.BlockSpec((TM, TN), lambda i, j: (i, j)),
        compiler_params=pltpu.CompilerParams(
            dimension_semantics=("parallel", "parallel"),
            vmem_limit_bytes=vmem_limit),
        cost_estimate=cost,
    )(x, w_fused, b_fused)

    out = out[:M]
    q = out[:, 0 * E:1 * E].reshape(B, S, E)[:, None]
    k = out[:, 1 * E:2 * E].reshape(B, S, E)[:, None]
    v = out[:, 2 * E:3 * E].reshape(B, S, E)[:, None]
    return q, k, v


# --------------------------------- demo ------------------------------------ #

def _init_linear(key, embed_dim):
    # Deterministic synthetic init (PyTorch nn.Linear-style uniform bound).
    kw, kb = jax.random.split(key)
    bound = 1.0 / jnp.sqrt(embed_dim)
    w = jax.random.uniform(kw, (embed_dim, embed_dim), jnp.float32,
                           minval=-bound, maxval=bound)
    b = jax.random.uniform(kb, (embed_dim,), jnp.float32,
                           minval=-bound, maxval=bound)
    return w, b


if __name__ == "__main__":
    B, S, E = 2, 8, 32
    key = jax.random.PRNGKey(0)
    k_feats, k_q, k_k, k_v = jax.random.split(key, 4)

    feats = jax.random.normal(k_feats, (B, S, E), jnp.float32)
    wq, bq = _init_linear(k_q, E)
    wk, bk = _init_linear(k_k, E)
    wv, bv = _init_linear(k_v, E)

    Q, K, V = diff_projection_attention(feats, wq, bq, wk, bk, wv, bv)
    jax.block_until_ready((Q, K, V))

    # Reference check against plain JAX (same math as PyTorch nn.Linear).
    Q_ref = (feats @ wq.T + bq)[:, None, :, :]
    K_ref = (feats @ wk.T + bk)[:, None, :, :]
    V_ref = (feats @ wv.T + bv)[:, None, :, :]
    assert Q.shape == (B, 1, S, E) and K.shape == (B, 1, S, E) and V.shape == (B, 1, S, E)
    assert jnp.allclose(Q, Q_ref, atol=1e-4)
    assert jnp.allclose(K, K_ref, atol=1e-4)
    assert jnp.allclose(V, V_ref, atol=1e-4)

    print("KERNEL_OK")
</pallas_src>

<mosaic_0001>
module attributes {stable_mosaic.version = 11 : i64} {
  func.func @_qkv_fused_kernel(%arg0: i32, %arg1: i32, %arg2: memref<8x32xf32, #tpu.memory_space<vmem>>, %arg3: memref<32x128xf32, #tpu.memory_space<vmem>>, %arg4: memref<1x128xf32, #tpu.memory_space<vmem>>, %arg5: memref<8x128xf32, #tpu.memory_space<vmem>>) attributes {dimension_semantics = [#tpu.dimension_semantics<parallel>, #tpu.dimension_semantics<parallel>], iteration_bounds = array<i64: 2, 1>, scalar_prefetch = 0 : i64, scratch_operands = 0 : i64, tpu.core_type = #tpu.core_type<tc>, window_params = [{transform_indices = @transform_0, window_bounds = array<i64: 8, 32>}, {transform_indices = @transform_1, window_bounds = array<i64: 32, 128>}, {transform_indices = @transform_2, window_bounds = array<i64: 1, 128>}, {transform_indices = @transform_3, window_bounds = array<i64: 8, 128>}]} {
    %c0 = arith.constant 0 : index
    %c0_0 = arith.constant 0 : index
    %0 = vector.load %arg2[%c0, %c0_0] : memref<8x32xf32, #tpu.memory_space<vmem>>, vector<8x32xf32>
    %c0_1 = arith.constant 0 : index
    %c0_2 = arith.constant 0 : index
    %1 = vector.load %arg3[%c0_1, %c0_2] : memref<32x128xf32, #tpu.memory_space<vmem>>, vector<32x128xf32>
    %cst = arith.constant dense<0.000000e+00> : vector<8x128xf32>
    %2 = tpu.matmul %0, %1, %cst {dimension_numbers = #tpu.dot_dimension_numbers<[1], [0], [0], [1], [0, 0, 1, 1], [], []>} : vector<8x32xf32>, vector<32x128xf32>, vector<8x128xf32> -> vector<8x128xf32>
    %c0_3 = arith.constant 0 : index
    %c0_4 = arith.constant 0 : index
    %3 = vector.load %arg4[%c0_3, %c0_4] : memref<1x128xf32, #tpu.memory_space<vmem>>, vector<1x128xf32>
    %4 = vector.broadcast %3 : vector<1x128xf32> to vector<8x128xf32>
    %5 = arith.addf %2, %4 : vector<8x128xf32>
    %c0_5 = arith.constant 0 : index
    %c0_6 = arith.constant 0 : index
    %6 = vector.load %arg5[%c0_5, %c0_6] : memref<8x128xf32, #tpu.memory_space<vmem>>, vector<8x128xf32>
    tpu.vector_store %arg5[%c0_5, %c0_6], %5 {strides = array<i32>} : memref<8x128xf32, #tpu.memory_space<vmem>>, vector<8x128xf32>,
    return
  }
  func.func @transform_0(%arg0: i32, %arg1: i32) -> (i32, i32) {
    %c0_i32 = arith.constant 0 : i32
    %c0_i32_0 = arith.constant 0 : i32
    return %arg0, %c0_i32 : i32, i32
  }
  func.func @transform_1(%arg0: i32, %arg1: i32) -> (i32, i32) {
    %c0_i32 = arith.constant 0 : i32
    %c0_i32_0 = arith.constant 0 : i32
    return %c0_i32, %arg1 : i32, i32
  }
  func.func @transform_2(%arg0: i32, %arg1: i32) -> (i32, i32) {
    %c0_i32 = arith.constant 0 : i32
    %c0_i32_0 = arith.constant 0 : i32
    return %c0_i32, %arg1 : i32, i32
  }
  func.func @transform_3(%arg0: i32, %arg1: i32) -> (i32, i32) {
    %c0_i32 = arith.constant 0 : i32
    return %arg0, %arg1 : i32, i32
  }
}

</mosaic_0001>

<bundles_post_ra>
// kernel: tpu_custom_call.1
= control target key start
LH: loop header
LB: loop body
LE: loop exit
PB: predicated region body
PF: predicated region fallthrough
CT: control target
= control target key end

     0   :  { %8 = vsyncpa [#allocation3], 0  ;;  %s895_s0 = inlined_call_operand.hbm [shape: f32[16,32], index: 0, kind: input, shape index: {}]   ;;  %s896_s1 = inlined_call_operand.hbm [shape: f32[32,128], index: 1, kind: input, shape index: {}]   ;;  %s897_s2 = inlined_call_operand.vmem [shape: f32[1,128], index: 2, kind: input, shape index: {}]   ;;  %s898_s3 = inlined_call_operand.hbm [shape: f32[16,128], index: 3, kind: output, shape index: {}]  }
   0x1   :  { %10 = vsyncpa [#allocation3 + $0x1], 0 }
   0x2   :  { %11 = vsyncpa [#allocation6], 0 }
   0x3   :  { %12 = vsyncpa [#allocation4], 0 }
   0x4   :  { %14 = vsyncpa [#allocation4 + $0x1], 0  ;;  %s719_s12 = smov 0   ;;  %s721_s13 = smov 0  }
   0x5   :  { %s723_s14 = smov 0   ;;  %s725_s15 = smov 0  }
   0x6   :  { %s727_s16 = smov 0   ;;  %s729_s17 = smov 0  }
   0x7 LB: > { %s441_s18 = sadd.s32 4294967295, %s690_s17   ;;  %s442_s19 = sadd.s32 4294967294, %s690_s17   ;;  %s690_s17 = sphi %s729_s17, %s20_s17   ;;  %s686_s16 = sphi %s727_s16, %s916_s16   ;;  %s682_s15 = sphi %s725_s15, %s915_s15   ;;  %s678_s14 = sphi %s723_s14, %s914_s14   ;;  %s674_s13 = sphi %s721_s13, %s913_s13   ;;  %s670_s12 = sphi %s719_s12, %s912_s12  }
   0x8   : > { %p52_p0 = scmp.ne.s32.totalorder %s674_s13, %s670_s12  ;;  %p753_p1 = scmp.eq.s32.totalorder %s441_s18, 0 }
   0x9   : > { %p757_p2 = scmp.eq.s32.totalorder %s441_s18, 1  ;;  %p136_p3 = scmp.eq.s32.totalorder %s442_s19, 1 }
   0xa   : > { %p763_p4 = por %p753_p1, %p52_p0  ;;  %p443_p5 = scmp.ge.s32.totalorder %s690_s17, 1 }
   0xb   : > { %p768_p6 = por %p136_p3, %p52_p0  ;;  %p143_p7 = scmp.lt.s32.totalorder %s690_s17, 3 }
   0xc   : > { %s902_s22 = scalar_select %p763_p4, 1, 0 }
   0xd   : > { %s903_s23 = scalar_select %p768_p6, 1, 0 }
   0xe   : > { %p773_p8 = pnand %p443_p5, %p143_p7  ;;  %s692_s25 = smov [#allocation5]  }
   0xf   : > { %s157_s26 = sshll.u32 %s692_s25, 4  ;;  %s32_s28 = sadd.s32 1, %s686_s16  ;;  %s158_s26 = int_to_ptr.vmem [resolvable:$true] %s157_s26 }
  0x10   : > { %p483_p9 = pneg %p773_p8  ;;  %s563_s29 = scalar_lea.vmem %s158_s26, 512 }
  0x11   : > { %p564_p13 = scmp.ne.s32.totalorder %s158_s26, %s563_s29  ;;  %p571_p5 = scmp.lt.s32.totalorder %s158_s26, %s158_s26 }
  0x12   : > { %p782_p11 = pnand %p483_p9, %p753_p1  ;;  %p572_p7 = scmp.lt.s32.totalorder %s563_s29, %s563_s29 }
  0x14   : > { %p554_p12 = pneg %p782_p11  ;;  %p573_p6 = por %p572_p7, %p571_p5 }
  0x16   : > { %p566_p0 = pnand %p564_p13, %p554_p12 }
  0x18   : > { %p567_p3 = pneg %p566_p0 }
  0x1a   : > { %p574_p4 = pnand %p573_p6, %p567_p3 }
  0x1c   : > { %577 = shalt.err (!%p574_p4)
}
  0x1d   : > { %s693_s30 = smov 128   ;;  %s694_s4 = smov 8  }
  0x1e   : > { %486 = dma.hbm_to_vmem [thread:$0]  (!%p782_p11), %s896_s1, 512, %s158_s26, [#allocation6], %s693_s30, %s693_s30, %s694_s4  }
  0x1f   : > { %p34_p6 = scmp.ge.s32.totalorder %s32_s28, 2  ;;  %s39_s7 = sadd.s32 1, %s678_s14 }
  0x20   : > { %p46_p4 = scmp.ne.s32.totalorder %s678_s14, %s674_s13  ;;  %p47_p9 = scmp.eq.s32.totalorder %s690_s17, 0 }
  0x21   : > { %s918_s28 = smov (%p34_p6, %s32_s28), 0  ;;  %p496_p0 = scmp.lt.s32.totalorder %s690_s17, 2 }
  0x22   : > { %p800_p12 = por %p47_p9, %p46_p4  ;;  %p806_p13 = por %p757_p2, %p46_p4 }
  0x23   : > { %s36_s10 = ssub.s32 %s686_s16, %s918_s28  ;;  %s177_s11 = sand.u32 1, %s678_s14  }
  0x24   : > { %p37_p11 = scmp.eq.s32.totalorder %s36_s10, 0  ;;  %s447_s18 = sshll.u32 %s177_s11, 3 }
  0x25   : > { %s448_s25 = sshll.u32 %s686_s16, 7  ;;  %s181_s30 = scalar_lea.vmem [#allocation2], %s447_s18 }
  0x26   : > { %s815_s19 = scalar_select %p37_p11, %s678_s14, %s39_s7  }
  0x27   : > { %s186_s29 = scalar_lea.hbm %s895_s0, %s448_s25  ;;  %s188_s4 = sshll.u32 %s181_s30, 4  ;;  %s189_s4 = int_to_ptr.vmem [resolvable:$true] %s188_s4 }
  0x28   : > { %p823_p2 = pnand %p496_p0, %p800_p12  ;;  %s178_s5 = scalar_lea.sflag [#allocation3], %s177_s11 }
  0x29   : > { %s591_s6 = scalar_lea.vmem %s189_s4, 128  ;;  %s695_s7 = smov [#allocation2]  }
  0x2a   : > { %p580_p3 = pneg %p823_p2  ;;  %p592_p5 = scmp.ne.s32.totalorder %s189_s4, %s591_s6 }
  0x2b   : > { %s596_s10 = sshll.u32 %s695_s7, 4  ;;  %s597_s10 = int_to_ptr.vmem [resolvable:$false] %s596_s10 }
  0x2c   : > { %p594_p7 = pnand %p592_p5, %p580_p3  ;;  %s598_s25 = scalar_lea.vmem %s597_s10, 256 }
  0x2d   : > { %p599_p4 = scmp.lt.s32.totalorder %s189_s4, %s597_s10  ;;  %p600_p9 = scmp.lt.s32.totalorder %s598_s25, %s591_s6 }
  0x2e   : > { %p595_p6 = pneg %p594_p7 }
  0x2f   : > { %p601_p11 = por %p600_p9, %p599_p4 }
  0x31   : > { %p602_p10 = pnand %p601_p11, %p595_p6 }
  0x33   : > { %605 = shalt.err (!%p602_p10)
}
  0x34   : > { %490 = dma.hbm_to_vmem [thread:$0]  (!%p823_p2), %s186_s29, 128, %s189_s4, %s178_s5  }
  0x35   : > { %197 = sbr.rel (%p773_p8) target bundleno = 278 (0x116), region = 32  ;;  %s834_s8 = sand.u32 (!%p773_p8), 1, %s674_s13  }
  0x36   : > { %s450_s11 = sshll.u32 (!%p773_p8), %s834_s8, 3  ;;  %s200_s18 = scalar_lea.sflag (!%p773_p8), [#allocation3], %s834_s8 }
  0x37   : > { %s203_s26 = scalar_lea.vmem (!%p773_p8), [#allocation2], %s450_s11  ;;  %p909_p12 = scmp.ne.s32.totalorder (!%p773_p8), %s902_s22, 0 }
  0x3a   : > { %657 = dma.done.wait (%p909_p12), %s200_s18, 128  }
  0x3b   : > { %659 = vsyncadd (%p909_p12), %s200_s18, 4294967168 }
  0x3c   : > { %661 = dma.done.wait (%p753_p1), [#allocation6], 512  }
  0x3d   : > { %663 = vsyncadd (%p753_p1), [#allocation6], 4294966784  ;;  %v696_v0 = vmov 0.0   ;;  %vm697_vm0 = vmmov 0   ;;  %v240_v1 = vld [vmem:[#allocation5 + $0x18] sm:$0xff]  ;;  %v239_v2 = vld [vmem:[#allocation5 + $0x10] sm:$0xff] }
  0x3e   : > { %464 = vmatprep.subr.mxu0 %v696_v0  ;;  %472 = vmatprep.mubr.msk.f32.mxu0 %vm697_vm0, %v696_v0  ;;  %v238_v3 = vld [vmem:[#allocation5 + $0x8] sm:$0xff]  ;;  %v237_v4 = vld [vmem:[#allocation5] sm:$0xff]  ;;  %v236_v5 = vld [vmem:[%s203_s26] sm:$0xff]  ;;  %vm248_vm1 = vcmask 261120   ;;  %s456_s24 = sshll.u32 %s682_s15, 7  ;;  %s232_s27 = scalar_lea.vmem [#allocation7], %s450_s11 }
  0x3f   : > { %465 = vmatpush3.msra.mxu0 %v240_v1  ;;  %v453_v6 = vld [vmem:[%s897_s2] ss:$0 sm:$0xff]  ;;  %s338_s29 = sshll.u32 %s232_s27, 4  ;;  %s853_s21 = scalar_lea.hbm %s898_s3, %s456_s24  ;;  %s339_s29 = int_to_ptr.vmem [resolvable:$true] %s338_s29 }
  0x40   : > { %466 = vmatprep.subr.mxu0 %v696_v0  ;;  %s324_s5 = scalar_lea.sflag [#allocation4], %s834_s8  ;;  %s606_s6 = scalar_lea.vmem %s339_s29, 128 }
  0x41   : > { %467 = vmatpush3.msra.mxu0 %v239_v2  ;;  %p607_p1 = scmp.ne.s32.totalorder %s339_s29, %s606_s6  ;;  %s698_s7 = smov [#allocation7]  }
  0x42   : > { %468 = vmatprep.subr.mxu0 %v696_v0  ;;  %s610_s15 = sshll.u32 %s698_s7, 4  ;;  %s611_s15 = int_to_ptr.vmem [resolvable:$false] %s610_s15 }
  0x43   : > { %469 = vmatpush3.msra.mxu0 %v238_v3  ;;  %p608_p8 = pnand %p607_p1, %p806_p13  ;;  %s612_s10 = scalar_lea.vmem %s611_s15, 256 }
  0x44   : > { %470 = vmatprep.subr.mxu0 %v696_v0  ;;  %p613_p0 = scmp.lt.s32.totalorder %s339_s29, %s611_s15  ;;  %p614_p2 = scmp.lt.s32.totalorder %s612_s10, %s606_s6 }
  0x45   : > { %471 = vmatpush3.msra.mxu0 %v237_v4  ;;  %p609_p10 = pneg %p608_p8 }
  0x46   : > { %473 = vmatmul.mubr.msk.f32.vlgmr.msra.gmra.mxu0 %vm248_vm1, %v236_v5  ;;  %p615_p3 = por %p614_p2, %p613_p0 }
  0x48   : > { %p616_p5 = pnand %p615_p3, %p609_p10 }
 0x106   : > { %v318_v7 = vpop.f32.mrf.mxu0 }
 0x107   : > { %v319_v8 = vadd.f32 %v453_v6, %v318_v7 }
 0x108   : > { %v474_v9 = vpop.f32.mrf.mxu0 }
 0x109   : > { %322 = vst [vmem:[%s232_s27] sm:$0xff] %v319_v8 }
 0x10a   : > { %619 = shalt.err (!%p616_p5)
}
 0x10b   : > { %s620_s25 = scalar_lea.hbm %s853_s21, 128  ;;  %s624_s18 = scalar_lea.hbm %s898_s3, 256 }
 0x10c   : > { %p621_p7 = scmp.ne.s32.totalorder %s853_s21, %s620_s25  ;;  %p625_p9 = scmp.lt.s32.totalorder %s853_s21, %s898_s3 }
 0x10d   : > { %p626_p11 = scmp.lt.s32.totalorder %s624_s18, %s620_s25 }
 0x10e   : > { %p622_p6 = pnand %p621_p7, %p806_p13 }
 0x10f   : > { %p627_p12 = por %p626_p11, %p625_p9 }
 0x110   : > { %p623_p4 = pneg %p622_p6 }
 0x112   : > { %p628_p1 = pnand %p627_p12, %p623_p4 }
 0x114   : > { %631 = shalt.err (!%p628_p1)
}
 0x115   : > { %481 = dma.vmem_to_hbm [thread:$0]  (%p806_p13), %s339_s29, 128, %s853_s21, %s324_s5  }
 0x116 PF: > { %s350_s22 = sand.u32 1, %s670_s12   ;;  %p910_p8 = scmp.ne.s32.totalorder %s903_s23, 0 }
 0x117   : > { %p911_p10 = scmp.ge.s32.totalorder %s690_s17, 2  ;;  %s351_s24 = scalar_lea.sflag [#allocation4], %s350_s22 }
 0x119   : > { %p492_p0 = pnand %p911_p10, %p910_p8 }
 0x11b   : > { %p493_p2 = pneg %p492_p0 }
 0x11d   : > { %665 = dma.done.wait (%p493_p2), %s351_s24, 128  }
 0x11e   : > { %667 = vsyncadd (%p493_p2), %s351_s24, 4294967168  ;;  %s20_s17 = sadd.s32 1, %s690_s17   ;;  %s912_s12 = smov %s674_s13 }
 0x11f   : > { %p17_p3 = scmp.ge.s32.totalorder %s20_s17, 4   ;;  %s913_s13 = smov %s678_s14 }
 0x120   : > { %s914_s14 = smov %s815_s19  ;;  %s915_s15 = smov %s686_s16 }
 0x121   : > { %s916_s16 = smov %s918_s28  ;;  %19 = sbr.rel (!%p17_p3) target bundleno = 7 (0x7), region = 85 }
 0x126   :  { %356 = vsyncpa [#allocation3], 1 }
 0x127   :  { %358 = vsyncpa [#allocation3 + $0x1], 1 }
 0x128   :  { %359 = vsyncpa [#allocation6], 1 }
 0x129   :  { %360 = vsyncpa [#allocation4], 1 }
 0x12a   :  { %362 = vsyncpa [#allocation4 + $0x1], 1 }

</bundles_post_ra>
